<compile_context>
chip_gen: v5e
topology: v5e:2x2
jax: 0.10.0
libtpu: 0.0.40
codegen_flags: <defaults>
</compile_context>

<pallas_src>
import functools

import jax
import jax.numpy as jnp
from jax.experimental import pallas as pl
from jax.experimental.pallas import tpu as pltpu


def actor_kernel(x_ref, w_in_ref, b_in_ref, w_h_ref, b_h_ref,
                 w_out_ref, b_out_ref, mean_ref, *, n_layers):
    tb = x_ref.shape[0]
    hidden = w_h_ref.shape[0]
    out_pad = w_out_ref.shape[1]

    # ---- input layer + tanh (K pre-padded to 8; single MXU pass) -----------
    b_in = jnp.broadcast_to(b_in_ref[...], (tb, hidden))   # hoisted broadcast
    h = jnp.tanh(
        jnp.dot(x_ref[...], w_in_ref[...],
                preferred_element_type=jnp.float32) + b_in)

    # ---- hidden layer applied n_layers times (same weights, as in PyTorch) -
    w_h = w_h_ref[...]
    b_h = jnp.broadcast_to(b_h_ref[...], (tb, hidden))     # hoisted broadcast

    def hidden_step(_, hh):
        return jnp.tanh(
            jnp.dot(hh, w_h, preferred_element_type=jnp.float32) + b_h)

    if n_layers <= 4:
        for _ in range(n_layers):
            h = hidden_step(0, h)
    else:
        h = jax.lax.fori_loop(0, n_layers, hidden_step, h, unroll=True)

    # ---- output layer (lane-dense: width pre-padded to 128) ----------------
    b_out = jnp.broadcast_to(b_out_ref[...], (tb, out_pad))
    mean_ref[...] = (
        jnp.dot(h, w_out_ref[...], preferred_element_type=jnp.float32) + b_out
    ).astype(mean_ref.dtype)


def prepare_params(params, input_size):
    """One-time parameter padding (hoisted out of the per-call path).

    * w_in padded on the input (K) axis to a multiple of 8 sublanes.
    * w_out / b_out padded on the output axis to a multiple of 128 lanes so
      the kernel's stores are full vst, not masked vst.msk.
    """
    w_in, b_in, w_h, b_h, w_out, b_out = params
    hidden = w_h.shape[0]
    output_size = w_out.shape[1]

    in_pad = max(8, pl.cdiv(input_size, 8) * 8)
    out_pad = max(128, pl.cdiv(output_size, 128) * 128)

    if in_pad != input_size:
        w_in_p = jnp.zeros((in_pad, hidden), jnp.float32)
        w_in_p = w_in_p.at[:input_size, :].set(w_in)
    else:
        w_in_p = w_in

    if out_pad != output_size:
        w_out_p = jnp.zeros((hidden, out_pad), jnp.float32)
        w_out_p = w_out_p.at[:, :output_size].set(w_out)
        b_out_p = jnp.zeros((1, out_pad), jnp.float32)
        b_out_p = b_out_p.at[:, :output_size].set(b_out)
    else:
        w_out_p, b_out_p = w_out, b_out

    return (w_in_p, b_in, w_h, b_h, w_out_p, b_out_p)


@functools.partial(
    jax.jit,
    static_argnames=("n_layers", "output_size", "max_single_tile",
                     "tile_batch"))
def actor_forward(x, padded_params, *, n_layers, output_size,
                  max_single_tile=2048, tile_batch=1024):
    """ActorNN forward. Returns (mean, std) where std = exp(-0.5*ones(out)),
    matching the PyTorch module (which exponentiates log_std before return).

    `padded_params` must come from prepare_params(); x padding and the output
    slice are fused with the pallas_call under jit."""
    w_in, b_in, w_h, b_h, w_out, b_out = padded_params
    batch, input_size = x.shape
    in_pad = w_in.shape[0]
    hidden = w_h.shape[0]
    out_pad = w_out.shape[1]

    # Single grid step (no per-step pipeline overhead) unless the batch is
    # large enough that tiling / megacore sharding actually pays off.
    batch8 = pl.cdiv(batch, 8) * 8
    tb = batch8 if batch8 <= max_single_tile else tile_batch
    b_pad = pl.cdiv(batch, tb) * tb

    if b_pad != batch or in_pad != input_size:
        x_p = jnp.zeros((b_pad, in_pad), x.dtype)
        x_p = x_p.at[:batch, :input_size].set(x)
    else:
        x_p = x

    grid = (b_pad // tb,)

    cost = pl.CostEstimate(
        flops=2 * b_pad * (in_pad * hidden
                           + n_layers * hidden * hidden
                           + hidden * out_pad),
        transcendentals=b_pad * hidden * (1 + n_layers),
        bytes_accessed=4 * (b_pad * in_pad
                            + in_pad * hidden + hidden
                            + hidden * hidden + hidden
                            + hidden * out_pad + out_pad
                            + b_pad * out_pad),
    )

    # x / mean tiled over the batch grid; weights pinned with constant maps
    # (VMEM-resident, not re-streamed per tile).
    const = lambda i: (0, 0)
    mean_full = pl.pallas_call(
        functools.partial(actor_kernel, n_layers=n_layers),
        out_shape=jax.ShapeDtypeStruct((b_pad, out_pad), jnp.float32),
        grid=grid,
        in_specs=[
            pl.BlockSpec((tb, in_pad), lambda i: (i, 0)),   # x (padded)
            pl.BlockSpec(w_in.shape, const),                # w_in (padded K)
            pl.BlockSpec(b_in.shape, const),                # b_in
            pl.BlockSpec(w_h.shape, const),                 # w_h
            pl.BlockSpec(b_h.shape, const),                 # b_h
            pl.BlockSpec(w_out.shape, const),               # w_out (padded N)
            pl.BlockSpec(b_out.shape, const),               # b_out (padded N)
        ],
        out_specs=pl.BlockSpec((tb, out_pad), lambda i: (i, 0)),
        compiler_params=pltpu.CompilerParams(
            dimension_semantics=("parallel",)),
        cost_estimate=cost,
    )(x_p, w_in, b_in, w_h, b_h, w_out, b_out)

    mean = mean_full[:batch, :output_size]

    # PyTorch module returns exp(log_std) with log_std = -0.5*ones(output_size).
    std = jnp.exp(-0.5 * jnp.ones((output_size,), dtype=jnp.float32))
    return mean, std


def init_params(key, input_size, output_size, hidden_size):
    """Deterministic synthetic parameters (PyTorch Linear-style uniform init),
    stored pre-transposed as (in, out)."""
    ks = jax.random.split(key, 6)

    def linear(kw, kb, fan_in, fan_out):
        bound = 1.0 / jnp.sqrt(jnp.float32(fan_in))
        w = jax.random.uniform(kw, (fan_in, fan_out), jnp.float32, -bound, bound)
        b = jax.random.uniform(kb, (1, fan_out), jnp.float32, -bound, bound)
        return w, b

    w_in, b_in = linear(ks[0], ks[1], input_size, hidden_size)
    w_h, b_h = linear(ks[2], ks[3], hidden_size, hidden_size)
    w_out, b_out = linear(ks[4], ks[5], hidden_size, output_size)
    return (w_in, b_in, w_h, b_h, w_out, b_out)


if __name__ == "__main__":
    # Inverted pendulum PPO sizes: obs dim 3, action dim 1, hidden 32.
    # Batch 256 = many vectorized-env states folded into one call; at this
    # size the kernel runs as a single grid step (no tiling overhead).
    input_size = 3
    output_size = 1
    hidden_size = 32
    n_layers = 2
    batch = 256

    key = jax.random.PRNGKey(0)
    k_params, k_x = jax.random.split(key)
    params = init_params(k_params, input_size, output_size, hidden_size)
    padded_params = prepare_params(params, input_size)   # one-time padding
    x = jax.random.normal(k_x, (batch, input_size), dtype=jnp.float32)

    mean, std = actor_forward(x, padded_params,
                              n_layers=n_layers, output_size=output_size)
    jax.block_until_ready((mean, std))

    # Pure-JAX reference check of the same forward (unpadded params).
    w_in, b_in, w_h, b_h, w_out, b_out = params
    h = jnp.tanh(x @ w_in + b_in)
    for _ in range(n_layers):
        h = jnp.tanh(h @ w_h + b_h)
    mean_ref = h @ w_out + b_out
    std_ref = jnp.exp(-0.5 * jnp.ones((output_size,), jnp.float32))

    assert mean.shape == (batch, output_size)
    assert std.shape == (output_size,)
    assert jnp.allclose(mean, mean_ref, atol=1e-5, rtol=1e-5)
    assert jnp.allclose(std, std_ref)

    # Also exercise a batch that is not a multiple of 8 (padding path).
    x_small = x[:10]
    mean_small, _ = actor_forward(x_small, padded_params,
                                  n_layers=n_layers, output_size=output_size)
    jax.block_until_ready(mean_small)
    assert mean_small.shape == (10, output_size)
    assert jnp.allclose(mean_small, mean_ref[:10], atol=1e-5, rtol=1e-5)

    print("KERNEL_OK")
</pallas_src>

<mosaic_0001>
module attributes {stable_mosaic.version = 11 : i64} {
  func.func @actor_kernel(%arg0: i32, %arg1: memref<256x8xf32, #tpu.memory_space<vmem>>, %arg2: memref<8x32xf32, #tpu.memory_space<vmem>>, %arg3: memref<1x32xf32, #tpu.memory_space<vmem>>, %arg4: memref<32x32xf32, #tpu.memory_space<vmem>>, %arg5: memref<1x32xf32, #tpu.memory_space<vmem>>, %arg6: memref<32x128xf32, #tpu.memory_space<vmem>>, %arg7: memref<1x128xf32, #tpu.memory_space<vmem>>, %arg8: memref<256x128xf32, #tpu.memory_space<vmem>>) attributes {dimension_semantics = [#tpu.dimension_semantics<parallel>], iteration_bounds = array<i64: 1>, scalar_prefetch = 0 : i64, scratch_operands = 0 : i64, tpu.core_type = #tpu.core_type<tc>, window_params = [{transform_indices = @transform_0, window_bounds = array<i64: 256, 8>}, {pipeline_mode = #tpu.pipeline_mode<synchronous>, transform_indices = @transform_1, window_bounds = array<i64: 8, 32>}, {pipeline_mode = #tpu.pipeline_mode<synchronous>, transform_indices = @transform_2, window_bounds = array<i64: 1, 32>}, {pipeline_mode = #tpu.pipeline_mode<synchronous>, transform_indices = @transform_3, window_bounds = array<i64: 32, 32>}, {pipeline_mode = #tpu.pipeline_mode<synchronous>, transform_indices = @transform_4, window_bounds = array<i64: 1, 32>}, {pipeline_mode = #tpu.pipeline_mode<synchronous>, transform_indices = @transform_5, window_bounds = array<i64: 32, 128>}, {pipeline_mode = #tpu.pipeline_mode<synchronous>, transform_indices = @transform_6, window_bounds = array<i64: 1, 128>}, {transform_indices = @transform_7, window_bounds = array<i64: 256, 128>}]} {
    %c0 = arith.constant 0 : index
    %c0_0 = arith.constant 0 : index
    %0 = vector.load %arg3[%c0, %c0_0] : memref<1x32xf32, #tpu.memory_space<vmem>>, vector<1x32xf32>
    %1 = vector.shape_cast %0 : vector<1x32xf32> to vector<1x32xf32>
    %2 = vector.broadcast %1 : vector<1x32xf32> to vector<256x32xf32>
    %c0_1 = arith.constant 0 : index
    %c0_2 = arith.constant 0 : index
    %3 = vector.load %arg1[%c0_1, %c0_2] : memref<256x8xf32, #tpu.memory_space<vmem>>, vector<256x8xf32>
    %c0_3 = arith.constant 0 : index
    %c0_4 = arith.constant 0 : index
    %4 = vector.load %arg2[%c0_3, %c0_4] : memref<8x32xf32, #tpu.memory_space<vmem>>, vector<8x32xf32>
    %cst = arith.constant dense<0.000000e+00> : vector<256x32xf32>
    %5 = tpu.matmul %3, %4, %cst {dimension_numbers = #tpu.dot_dimension_numbers<[1], [0], [0], [1], [0, 0, 1, 1], [], []>} : vector<256x8xf32>, vector<8x32xf32>, vector<256x32xf32> -> vector<256x32xf32>
    %6 = arith.addf %5, %2 : vector<256x32xf32>
    %7 = math.tanh %6 : vector<256x32xf32>
    %c0_5 = arith.constant 0 : index
    %c0_6 = arith.constant 0 : index
    %8 = vector.load %arg4[%c0_5, %c0_6] : memref<32x32xf32, #tpu.memory_space<vmem>>, vector<32x32xf32>
    %c0_7 = arith.constant 0 : index
    %c0_8 = arith.constant 0 : index
    %9 = vector.load %arg5[%c0_7, %c0_8] : memref<1x32xf32, #tpu.memory_space<vmem>>, vector<1x32xf32>
    %10 = vector.shape_cast %9 : vector<1x32xf32> to vector<1x32xf32>
    %11 = vector.broadcast %10 : vector<1x32xf32> to vector<256x32xf32>
    %cst_9 = arith.constant dense<0.000000e+00> : vector<256x32xf32>
    %12 = tpu.matmul %7, %8, %cst_9 {dimension_numbers = #tpu.dot_dimension_numbers<[1], [0], [0], [1], [0, 0, 1, 1], [], []>} : vector<256x32xf32>, vector<32x32xf32>, vector<256x32xf32> -> vector<256x32xf32>
    %13 = arith.addf %12, %11 : vector<256x32xf32>
    %14 = math.tanh %13 : vector<256x32xf32>
    %cst_10 = arith.constant dense<0.000000e+00> : vector<256x32xf32>
    %15 = tpu.matmul %14, %8, %cst_10 {dimension_numbers = #tpu.dot_dimension_numbers<[1], [0], [0], [1], [0, 0, 1, 1], [], []>} : vector<256x32xf32>, vector<32x32xf32>, vector<256x32xf32> -> vector<256x32xf32>
    %16 = arith.addf %15, %11 : vector<256x32xf32>
    %17 = math.tanh %16 : vector<256x32xf32>
    %c0_11 = arith.constant 0 : index
    %c0_12 = arith.constant 0 : index
    %18 = vector.load %arg7[%c0_11, %c0_12] : memref<1x128xf32, #tpu.memory_space<vmem>>, vector<1x128xf32>
    %19 = vector.shape_cast %18 : vector<1x128xf32> to vector<1x128xf32>
    %20 = vector.broadcast %19 : vector<1x128xf32> to vector<256x128xf32>
    %c0_13 = arith.constant 0 : index
    %c0_14 = arith.constant 0 : index
    %21 = vector.load %arg6[%c0_13, %c0_14] : memref<32x128xf32, #tpu.memory_space<vmem>>, vector<32x128xf32>
    %cst_15 = arith.constant dense<0.000000e+00> : vector<256x128xf32>
    %22 = tpu.matmul %17, %21, %cst_15 {dimension_numbers = #tpu.dot_dimension_numbers<[1], [0], [0], [1], [0, 0, 1, 1], [], []>} : vector<256x32xf32>, vector<32x128xf32>, vector<256x128xf32> -> vector<256x128xf32>
    %23 = arith.addf %22, %20 : vector<256x128xf32>
    %c0_16 = arith.constant 0 : index
    %c0_17 = arith.constant 0 : index
    %24 = vector.load %arg8[%c0_16, %c0_17] : memref<256x128xf32, #tpu.memory_space<vmem>>, vector<256x128xf32>
    tpu.vector_store %arg8[%c0_16, %c0_17], %23 {strides = array<i32>} : memref<256x128xf32, #tpu.memory_space<vmem>>, vector<256x128xf32>,
    return
  }
  func.func @transform_0(%arg0: i32) -> (i32, i32) {
    %c0_i32 = arith.constant 0 : i32
    %c0_i32_0 = arith.constant 0 : i32
    return %arg0, %c0_i32 : i32, i32
  }
  func.func @transform_1(%arg0: i32) -> (i32, i32) {
    %c0_i32 = arith.constant 0 : i32
    %c0_i32_0 = arith.constant 0 : i32
    %c0_i32_1 = arith.constant 0 : i32
    return %c0_i32, %c0_i32_0 : i32, i32
  }
  func.func @transform_2(%arg0: i32) -> (i32, i32) {
    %c0_i32 = arith.constant 0 : i32
    %c0_i32_0 = arith.constant 0 : i32
    %c0_i32_1 = arith.constant 0 : i32
    return %c0_i32, %c0_i32_0 : i32, i32
  }
  func.func @transform_3(%arg0: i32) -> (i32, i32) {
    %c0_i32 = arith.constant 0 : i32
    %c0_i32_0 = arith.constant 0 : i32
    %c0_i32_1 = arith.constant 0 : i32
    return %c0_i32, %c0_i32_0 : i32, i32
  }
  func.func @transform_4(%arg0: i32) -> (i32, i32) {
    %c0_i32 = arith.constant 0 : i32
    %c0_i32_0 = arith.constant 0 : i32
    %c0_i32_1 = arith.constant 0 : i32
    return %c0_i32, %c0_i32_0 : i32, i32
  }
  func.func @transform_5(%arg0: i32) -> (i32, i32) {
    %c0_i32 = arith.constant 0 : i32
    %c0_i32_0 = arith.constant 0 : i32
    %c0_i32_1 = arith.constant 0 : i32
    return %c0_i32, %c0_i32_0 : i32, i32
  }
  func.func @transform_6(%arg0: i32) -> (i32, i32) {
    %c0_i32 = arith.constant 0 : i32
    %c0_i32_0 = arith.constant 0 : i32
    %c0_i32_1 = arith.constant 0 : i32
    return %c0_i32, %c0_i32_0 : i32, i32
  }
  func.func @transform_7(%arg0: i32) -> (i32, i32) {
    %c0_i32 = arith.constant 0 : i32
    %c0_i32_0 = arith.constant 0 : i32
    return %arg0, %c0_i32 : i32, i32
  }
}

</mosaic_0001>

<bundles_post_ra>
// kernel: actor_forward.1
= control target key start
LH: loop header
LB: loop body
LE: loop exit
PB: predicated region body
PF: predicated region fallthrough
CT: control target
= control target key end

     0   :  { %vm63_vm0 = vcmask 64512   ;;  %vm313_vm1 = vcmask 261120   ;;  %s1902_s1 = inlined_call_operand.vmem [shape: f32[8,32], index: 1, kind: input, shape index: {}]   ;;  %s1903_s0 = inlined_call_operand.vmem [shape: f32[256,8], index: 0, kind: input, shape index: {}]   ;;  %s1904_s2 = inlined_call_operand.vmem [shape: f32[1,32], index: 2, kind: input, shape index: {}]   ;;  %s1905_s3 = inlined_call_operand.vmem [shape: f32[32,32], index: 3, kind: input, shape index: {}]   ;;  %s1906_s4 = inlined_call_operand.vmem [shape: f32[1,32], index: 4, kind: input, shape index: {}]   ;;  %s1907_s5 = inlined_call_operand.vmem [shape: f32[32,128], index: 5, kind: input, shape index: {}]   ;;  %s1908_s6 = inlined_call_operand.vmem [shape: f32[1,128], index: 6, kind: input, shape index: {}]   ;;  %s1909_s7 = inlined_call_operand.vmem [shape: f32[256,128], index: 7, kind: output, shape index: {}]  }
   0x1   :  { %v62_v0 = vld [vmem:[%s1902_s1] sm:$0xff]  ;;  %v31_v2 = vld [vmem:[%s1903_s0 + $0x8] sm:$0xff]  ;;  %v32_v3 = vld [vmem:[%s1903_s0 + $0x10] sm:$0xff] }
   0x2   :  { %v30_v1 = vld [vmem:[%s1903_s0] sm:$0xff]  ;;  %175 = vmatpush.msra.mxu0 %v62_v0  ;;  %v33_v4 = vld [vmem:[%s1903_s0 + $0x18] sm:$0xff]  ;;  %v35_v6 = vld [vmem:[%s1903_s0 + $0x28] sm:$0xff] }
   0x3   :  { %1049 = vmatmul.msk.f32.vlgmr.msra.gmra.mxu0 %vm63_vm0, %v30_v1  ;;  %v34_v5 = vld [vmem:[%s1903_s0 + $0x20] sm:$0xff]  ;;  %v36_v7 = vld [vmem:[%s1903_s0 + $0x30] sm:$0xff]  ;;  %v37_v8 = vld [vmem:[%s1903_s0 + $0x38] sm:$0xff] }
   0x4   :  { %v38_v9 = vld [vmem:[%s1903_s0 + $0x40] sm:$0xff]  ;;  %v39_v10 = vld [vmem:[%s1903_s0 + $0x48] sm:$0xff]  ;;  %v40_v11 = vld [vmem:[%s1903_s0 + $0x50] sm:$0xff] }
   0x5   :  { %v41_v12 = vld [vmem:[%s1903_s0 + $0x58] sm:$0xff]  ;;  %v42_v13 = vld [vmem:[%s1903_s0 + $0x60] sm:$0xff]  ;;  %v307_v15 = vld [vmem:[%s1905_s3 + $0x10] sm:$0xff] }
   0x6   :  { %v308_v14 = vld [vmem:[%s1905_s3 + $0x18] sm:$0xff]  ;;  %v306_v16 = vld [vmem:[%s1905_s3 + $0x8] sm:$0xff]  ;;  %v305_v18 = vld [vmem:[%s1905_s3] sm:$0xff] }
   0x7   :  { %422 = vmatpush.msra.mxu1 %v308_v14  ;;  %663 = vmatpush.msra.mxu2 %v308_v14  ;;  %v43_v17 = vld [vmem:[%s1903_s0 + $0x68] sm:$0xff]  ;;  %v44_v19 = vld [vmem:[%s1903_s0 + $0x70] sm:$0xff]  ;;  %v45_v20 = vld [vmem:[%s1903_s0 + $0x78] sm:$0xff] }
   0x8   :  { %v1494_v21 = vld [vmem:[%s1904_s2] ss:$0 sm:$0xff]  ;;  %v47_v26 = vld [vmem:[%s1903_s0 + $0x88] sm:$0xff]  ;;  %v48_v30 = vld [vmem:[%s1903_s0 + $0x90] sm:$0xff] }
   0x9   :  { %423 = vmatpush.msra.mxu1 %v307_v15  ;;  %664 = vmatpush.msra.mxu2 %v307_v15  ;;  %v46_v23 = vld [vmem:[%s1903_s0 + $0x80] sm:$0xff]  ;;  %v49_v34 = vld [vmem:[%s1903_s0 + $0x98] sm:$0xff]  ;;  %v51_v42 = vld [vmem:[%s1903_s0 + $0xa8] sm:$0xff] }
   0xa   :  { %v50_v38 = vld [vmem:[%s1903_s0 + $0xa0] sm:$0xff]  ;;  %v52_v46 = vld [vmem:[%s1903_s0 + $0xb0] sm:$0xff]  ;;  %v53_v50 = vld [vmem:[%s1903_s0 + $0xb8] sm:$0xff] }
   0xb   :  { %1050 = vmatmul.msk.f32.gmra.mxu0 %vm63_vm0, %v31_v2  ;;  %424 = vmatpush.msra.mxu1 %v306_v16  ;;  %v54_v54 = vld [vmem:[%s1903_s0 + $0xc0] sm:$0xff]  ;;  %v55_v58 = vld [vmem:[%s1903_s0 + $0xc8] sm:$0xff]  ;;  %v56_v62 = vld [vmem:[%s1903_s0 + $0xd0] sm:$0xff] }
   0xc   :  { %665 = vmatpush.msra.mxu2 %v306_v16  ;;  %v57_v2 = vld [vmem:[%s1903_s0 + $0xd8] sm:$0xff]  ;;  %v60_v14 = vld [vmem:[%s1903_s0 + $0xf0] sm:$0xff] }
   0xd   :  { %425 = vmatpush.msra.mxu1 %v305_v18 }
   0xe   :  { %666 = vmatpush.msra.mxu2 %v305_v18  ;;  %v61_v18 = vld [vmem:[%s1903_s0 + $0xf8] sm:$0xff] }
  0x13   :  { %1051 = vmatmul.msk.f32.gmra.mxu0 %vm63_vm0, %v32_v3 }
  0x1b   :  { %1052 = vmatmul.msk.f32.gmra.mxu0 %vm63_vm0, %v33_v4 }
  0x23   :  { %1053 = vmatmul.msk.f32.gmra.mxu0 %vm63_vm0, %v34_v5 }
  0x2b   :  { %1054 = vmatmul.msk.f32.gmra.mxu0 %vm63_vm0, %v35_v6  ;;  %v58_v6 = vld [vmem:[%s1903_s0 + $0xe0] sm:$0xff] }
  0x33   :  { %1055 = vmatmul.msk.f32.gmra.mxu0 %vm63_vm0, %v36_v7 }
  0x3b   :  { %1056 = vmatmul.msk.f32.gmra.mxu0 %vm63_vm0, %v37_v8 }
  0x43   :  { %1057 = vmatmul.msk.f32.gmra.mxu0 %vm63_vm0, %v38_v9 }
  0x4b   :  { %1058 = vmatmul.msk.f32.gmra.mxu0 %vm63_vm0, %v39_v10  ;;  %v59_v10 = vld [vmem:[%s1903_s0 + $0xe8] sm:$0xff] }
  0x53   :  { %1059 = vmatmul.msk.f32.gmra.mxu0 %vm63_vm0, %v40_v11 }
  0x5b   :  { %1060 = vmatmul.msk.f32.gmra.mxu0 %vm63_vm0, %v41_v12 }
  0x63   :  { %1061 = vmatmul.msk.f32.gmra.mxu0 %vm63_vm0, %v42_v13 }
  0x6b   :  { %1062 = vmatmul.msk.f32.gmra.mxu0 %vm63_vm0, %v43_v17 }
  0x73   :  { %1063 = vmatmul.msk.f32.gmra.mxu0 %vm63_vm0, %v44_v19 }
  0x7b   :  { %1064 = vmatmul.msk.f32.gmra.mxu0 %vm63_vm0, %v45_v20 }
  0x80   :  { %v177_v22 = vpop.f32.mrf.mxu0 }
  0x81   :  { %v178_v24 = vadd.f32 %v1494_v21, %v177_v22 }
  0x83   :  { %1180 = vtanh.f32 %v178_v24  ;;  %1065 = vmatmul.msk.f32.gmra.mxu0 %vm63_vm0, %v46_v23 }
  0x88   :  { %v180_v25 = vpop.f32.mrf.mxu0 }
  0x89   :  { %v1181_v27 = vpop.eup %1180  ;;  %v181_v28 = vadd.f32 %v1494_v21, %v180_v25  ;;  %v1596_v25 = vld [vmem:[%s1906_s4] ss:$0 sm:$0xff] }
  0x8a   :  { %1081 = vmatmul.msk.f32.vlgmr.msra.gmra.mxu1 %vm313_vm1, %v1181_v27 }
  0x8b   :  { %1182 = vtanh.f32 %v181_v28  ;;  %1066 = vmatmul.msk.f32.gmra.mxu0 %vm63_vm0, %v47_v26 }
  0x90   :  { %v183_v29 = vpop.f32.mrf.mxu0 }
  0x91   :  { %v1183_v31 = vpop.eup %1182  ;;  %v184_v32 = vadd.f32 %v1494_v21, %v183_v29 }
  0x92   :  { %1082 = vmatmul.msk.f32.gmra.mxu1 %vm313_vm1, %v1183_v31 }
  0x93   :  { %1184 = vtanh.f32 %v184_v32  ;;  %1067 = vmatmul.msk.f32.gmra.mxu0 %vm63_vm0, %v48_v30 }
  0x98   :  { %v186_v33 = vpop.f32.mrf.mxu0 }
  0x99   :  { %v1185_v35 = vpop.eup %1184  ;;  %v187_v36 = vadd.f32 %v1494_v21, %v186_v33 }
  0x9a   :  { %1083 = vmatmul.msk.f32.gmra.mxu1 %vm313_vm1, %v1185_v35 }
  0x9b   :  { %1186 = vtanh.f32 %v187_v36  ;;  %1068 = vmatmul.msk.f32.gmra.mxu0 %vm63_vm0, %v49_v34 }
  0xa0   :  { %v189_v37 = vpop.f32.mrf.mxu0 }
  0xa1   :  { %v1187_v39 = vpop.eup %1186  ;;  %v190_v40 = vadd.f32 %v1494_v21, %v189_v37 }
  0xa2   :  { %1084 = vmatmul.msk.f32.gmra.mxu1 %vm313_vm1, %v1187_v39 }
  0xa3   :  { %1188 = vtanh.f32 %v190_v40  ;;  %1069 = vmatmul.msk.f32.gmra.mxu0 %vm63_vm0, %v50_v38 }
  0xa8   :  { %v192_v41 = vpop.f32.mrf.mxu0 }
  0xa9   :  { %v1189_v43 = vpop.eup %1188  ;;  %v193_v44 = vadd.f32 %v1494_v21, %v192_v41 }
  0xaa   :  { %1085 = vmatmul.msk.f32.gmra.mxu1 %vm313_vm1, %v1189_v43 }
  0xab   :  { %1190 = vtanh.f32 %v193_v44  ;;  %1070 = vmatmul.msk.f32.gmra.mxu0 %vm63_vm0, %v51_v42 }
  0xb0   :  { %v195_v45 = vpop.f32.mrf.mxu0 }
  0xb1   :  { %v1191_v47 = vpop.eup %1190  ;;  %v196_v48 = vadd.f32 %v1494_v21, %v195_v45 }
  0xb2   :  { %1086 = vmatmul.msk.f32.gmra.mxu1 %vm313_vm1, %v1191_v47 }
  0xb3   :  { %1192 = vtanh.f32 %v196_v48  ;;  %1071 = vmatmul.msk.f32.gmra.mxu0 %vm63_vm0, %v52_v46 }
  0xb8   :  { %v198_v49 = vpop.f32.mrf.mxu0 }
  0xb9   :  { %v1193_v51 = vpop.eup %1192  ;;  %v199_v52 = vadd.f32 %v1494_v21, %v198_v49 }
  0xba   :  { %1087 = vmatmul.msk.f32.gmra.mxu1 %vm313_vm1, %v1193_v51 }
  0xbb   :  { %1194 = vtanh.f32 %v199_v52  ;;  %1072 = vmatmul.msk.f32.gmra.mxu0 %vm63_vm0, %v53_v50 }
  0xc0   :  { %v201_v53 = vpop.f32.mrf.mxu0 }
  0xc1   :  { %v1195_v55 = vpop.eup %1194  ;;  %v202_v56 = vadd.f32 %v1494_v21, %v201_v53 }
  0xc2   :  { %1088 = vmatmul.msk.f32.gmra.mxu1 %vm313_vm1, %v1195_v55 }
  0xc3   :  { %1196 = vtanh.f32 %v202_v56  ;;  %1073 = vmatmul.msk.f32.gmra.mxu0 %vm63_vm0, %v54_v54 }
  0xc8   :  { %v204_v57 = vpop.f32.mrf.mxu0 }
  0xc9   :  { %v1197_v59 = vpop.eup %1196  ;;  %v205_v60 = vadd.f32 %v1494_v21, %v204_v57 }
  0xca   :  { %1089 = vmatmul.msk.f32.gmra.mxu1 %vm313_vm1, %v1197_v59 }
  0xcb   :  { %1198 = vtanh.f32 %v205_v60  ;;  %1074 = vmatmul.msk.f32.gmra.mxu0 %vm63_vm0, %v55_v58 }
  0xd0   :  { %v207_v61 = vpop.f32.mrf.mxu0 }
  0xd1   :  { %v1199_v63 = vpop.eup %1198  ;;  %v208_v0 = vadd.f32 %v1494_v21, %v207_v61 }
  0xd2   :  { %1090 = vmatmul.msk.f32.gmra.mxu1 %vm313_vm1, %v1199_v63 }
  0xd3   :  { %1200 = vtanh.f32 %v208_v0  ;;  %1075 = vmatmul.msk.f32.gmra.mxu0 %vm63_vm0, %v56_v62 }
  0xd8   :  { %v210_v1 = vpop.f32.mrf.mxu0 }
  0xd9   :  { %v1201_v3 = vpop.eup %1200  ;;  %v211_v4 = vadd.f32 %v1494_v21, %v210_v1 }
  0xda   :  { %1091 = vmatmul.msk.f32.gmra.mxu1 %vm313_vm1, %v1201_v3 }
  0xdb   :  { %1202 = vtanh.f32 %v211_v4  ;;  %1076 = vmatmul.msk.f32.gmra.mxu0 %vm63_vm0, %v57_v2 }
  0xe0   :  { %v213_v5 = vpop.f32.mrf.mxu0 }
  0xe1   :  { %v1203_v7 = vpop.eup %1202  ;;  %v214_v8 = vadd.f32 %v1494_v21, %v213_v5 }
  0xe2   :  { %1092 = vmatmul.msk.f32.gmra.mxu1 %vm313_vm1, %v1203_v7 }
  0xe3   :  { %1204 = vtanh.f32 %v214_v8  ;;  %1077 = vmatmul.msk.f32.gmra.mxu0 %vm63_vm0, %v58_v6 }
  0xe8   :  { %v216_v9 = vpop.f32.mrf.mxu0 }
  0xe9   :  { %v1205_v11 = vpop.eup %1204  ;;  %v217_v12 = vadd.f32 %v1494_v21, %v216_v9 }
  0xea   :  { %1093 = vmatmul.msk.f32.gmra.mxu1 %vm313_vm1, %v1205_v11 }
  0xeb   :  { %1206 = vtanh.f32 %v217_v12  ;;  %1078 = vmatmul.msk.f32.gmra.mxu0 %vm63_vm0, %v59_v10 }
  0xf0   :  { %v219_v13 = vpop.f32.mrf.mxu0 }
  0xf1   :  { %v1207_v15 = vpop.eup %1206  ;;  %v220_v16 = vadd.f32 %v1494_v21, %v219_v13 }
  0xf2   :  { %1094 = vmatmul.msk.f32.gmra.mxu1 %vm313_vm1, %v1207_v15 }
  0xf3   :  { %1208 = vtanh.f32 %v220_v16  ;;  %1079 = vmatmul.msk.f32.gmra.mxu0 %vm63_vm0, %v60_v14 }
  0xf8   :  { %v222_v17 = vpop.f32.mrf.mxu0 }
  0xf9   :  { %v1209_v19 = vpop.eup %1208  ;;  %v223_v20 = vadd.f32 %v1494_v21, %v222_v17 }
  0xfa   :  { %1095 = vmatmul.msk.f32.gmra.mxu1 %vm313_vm1, %v1209_v19 }
  0xfb   :  { %1210 = vtanh.f32 %v223_v20  ;;  %1080 = vmatmul.msk.f32.gmra.mxu0 %vm63_vm0, %v61_v18 }
 0x100   :  { %v225_v22 = vpop.f32.mrf.mxu0 }
 0x101   :  { %v1211_v23 = vpop.eup %1210  ;;  %v226_v24 = vadd.f32 %v1494_v21, %v225_v22 }
 0x102   :  { %1096 = vmatmul.msk.f32.gmra.mxu1 %vm313_vm1, %v1211_v23 }
 0x103   :  { %1212 = vtanh.f32 %v226_v24 }
 0x107   :  { %v427_v26 = vpop.f32.mrf.mxu1 }
 0x108   :  { %v428_v27 = vadd.f32 %v1596_v25, %v427_v26  ;;  %v228_v28 = vpop.f32.mrf.mxu0 }
 0x109   :  { %v1213_v29 = vpop.eup %1212  ;;  %v229_v30 = vadd.f32 %v1494_v21, %v228_v28 }
 0x10a   :  { %1214 = vtanh.f32 %v428_v27  ;;  %1097 = vmatmul.msk.f32.gmra.mxu1 %vm313_vm1, %v1213_v29 }
 0x10b   :  { %1216 = vtanh.f32 %v229_v30 }
 0x10f   :  { %v430_v31 = vpop.f32.mrf.mxu1 }
 0x110   :  { %v1215_v32 = vpop.eup %1214  ;;  %v431_v33 = vadd.f32 %v1596_v25, %v430_v31  ;;  %v231_v34 = vpop.f32.mrf.mxu0 }
 0x111   :  { %v1217_v35 = vpop.eup %1216  ;;  %v232_v36 = vadd.f32 %v1494_v21, %v231_v34  ;;  %1113 = vmatmul.msk.f32.vlgmr.msra.gmra.mxu2 %vm313_vm1, %v1215_v32 }
 0x112   :  { %1218 = vtanh.f32 %v431_v33  ;;  %1098 = vmatmul.msk.f32.gmra.mxu1 %vm313_vm1, %v1217_v35 }
 0x113   :  { %1220 = vtanh.f32 %v232_v36 }
 0x117   :  { %v433_v37 = vpop.f32.mrf.mxu1 }
 0x118   :  { %v1219_v38 = vpop.eup %1218  ;;  %v434_v39 = vadd.f32 %v1596_v25, %v433_v37  ;;  %v234_v40 = vpop.f32.mrf.mxu0 }
 0x119   :  { %v1221_v41 = vpop.eup %1220  ;;  %v235_v42 = vadd.f32 %v1494_v21, %v234_v40  ;;  %1114 = vmatmul.msk.f32.gmra.mxu2 %vm313_vm1, %v1219_v38 }
 0x11a   :  { %1222 = vtanh.f32 %v434_v39  ;;  %1099 = vmatmul.msk.f32.gmra.mxu1 %vm313_vm1, %v1221_v41 }
 0x11b   :  { %1224 = vtanh.f32 %v235_v42 }
 0x11f   :  { %v436_v43 = vpop.f32.mrf.mxu1 }
 0x120   :  { %v1223_v44 = vpop.eup %1222  ;;  %v437_v45 = vadd.f32 %v1596_v25, %v436_v43  ;;  %v237_v46 = vpop.f32.mrf.mxu0 }
 0x121   :  { %v1225_v47 = vpop.eup %1224  ;;  %v238_v48 = vadd.f32 %v1494_v21, %v237_v46  ;;  %1115 = vmatmul.msk.f32.gmra.mxu2 %vm313_vm1, %v1223_v44 }
 0x122   :  { %1226 = vtanh.f32 %v437_v45  ;;  %1100 = vmatmul.msk.f32.gmra.mxu1 %vm313_vm1, %v1225_v47  ;;  %v803_v47 = vld [vmem:[%s1907_s5 + $0x18] sm:$0xff] }
 0x123   :  { %1228 = vtanh.f32 %v238_v48  ;;  %912 = vmatpush.msra.mxu3 %v803_v47 }
 0x127   :  { %v439_v49 = vpop.f32.mrf.mxu1 }
 0x128   :  { %v1227_v50 = vpop.eup %1226  ;;  %v440_v51 = vadd.f32 %v1596_v25, %v439_v49  ;;  %v240_v52 = vpop.f32.mrf.mxu0 }
 0x129   :  { %v1229_v53 = vpop.eup %1228  ;;  %v241_v54 = vadd.f32 %v1494_v21, %v240_v52  ;;  %1116 = vmatmul.msk.f32.gmra.mxu2 %vm313_vm1, %v1227_v50  ;;  %v802_v52 = vld [vmem:[%s1907_s5 + $0x10] sm:$0xff] }
 0x12a   :  { %1230 = vtanh.f32 %v440_v51  ;;  %1101 = vmatmul.msk.f32.gmra.mxu1 %vm313_vm1, %v1229_v53  ;;  %913 = vmatpush.msra.mxu3 %v802_v52 }
 0x12b   :  { %1232 = vtanh.f32 %v241_v54 }
 0x12f   :  { %v442_v55 = vpop.f32.mrf.mxu1 }
 0x130   :  { %v1231_v56 = vpop.eup %1230  ;;  %v443_v57 = vadd.f32 %v1596_v25, %v442_v55  ;;  %v243_v58 = vpop.f32.mrf.mxu0  ;;  %v801_v55 = vld [vmem:[%s1907_s5 + $0x8] sm:$0xff] }
 0x131   :  { %v1233_v59 = vpop.eup %1232  ;;  %v244_v60 = vadd.f32 %v1494_v21, %v243_v58  ;;  %1117 = vmatmul.msk.f32.gmra.mxu2 %vm313_vm1, %v1231_v56  ;;  %914 = vmatpush.msra.mxu3 %v801_v55  ;;  %v800_v56 = vld [vmem:[%s1907_s5] sm:$0xff] }
 0x132   :  { %1234 = vtanh.f32 %v443_v57  ;;  %1102 = vmatmul.msk.f32.gmra.mxu1 %vm313_vm1, %v1233_v59 }
 0x133   :  { %1236 = vtanh.f32 %v244_v60  ;;  %915 = vmatpush.msra.mxu3 %v800_v56 }
 0x137   :  { %v445_v61 = vpop.f32.mrf.mxu1 }
 0x138   :  { %v1235_v62 = vpop.eup %1234  ;;  %v446_v63 = vadd.f32 %v1596_v25, %v445_v61  ;;  %v246_v0 = vpop.f32.mrf.mxu0 }
 0x139   :  { %v1237_v1 = vpop.eup %1236  ;;  %v247_v2 = vadd.f32 %v1494_v21, %v246_v0  ;;  %1118 = vmatmul.msk.f32.gmra.mxu2 %vm313_vm1, %v1235_v62 }
 0x13a   :  { %1238 = vtanh.f32 %v446_v63  ;;  %1103 = vmatmul.msk.f32.gmra.mxu1 %vm313_vm1, %v1237_v1 }
 0x13b   :  { %1240 = vtanh.f32 %v247_v2 }
 0x13f   :  { %v448_v3 = vpop.f32.mrf.mxu1 }
 0x140   :  { %v1239_v4 = vpop.eup %1238  ;;  %v449_v5 = vadd.f32 %v1596_v25, %v448_v3  ;;  %v249_v6 = vpop.f32.mrf.mxu0 }
 0x141   :  { %v1241_v7 = vpop.eup %1240  ;;  %v250_v8 = vadd.f32 %v1494_v21, %v249_v6  ;;  %1119 = vmatmul.msk.f32.gmra.mxu2 %vm313_vm1, %v1239_v4 }
 0x142   :  { %1242 = vtanh.f32 %v449_v5  ;;  %1104 = vmatmul.msk.f32.gmra.mxu1 %vm313_vm1, %v1241_v7 }
 0x143   :  { %1244 = vtanh.f32 %v250_v8 }
 0x147   :  { %v451_v9 = vpop.f32.mrf.mxu1 }
 0x148   :  { %v1243_v10 = vpop.eup %1242  ;;  %v452_v11 = vadd.f32 %v1596_v25, %v451_v9  ;;  %v252_v12 = vpop.f32.mrf.mxu0 }
 0x149   :  { %v1245_v13 = vpop.eup %1244  ;;  %v253_v14 = vadd.f32 %v1494_v21, %v252_v12  ;;  %1120 = vmatmul.msk.f32.gmra.mxu2 %vm313_vm1, %v1243_v10 }
 0x14a   :  { %1246 = vtanh.f32 %v452_v11  ;;  %1105 = vmatmul.msk.f32.gmra.mxu1 %vm313_vm1, %v1245_v13 }
 0x14b   :  { %1248 = vtanh.f32 %v253_v14 }
 0x14f   :  { %v454_v15 = vpop.f32.mrf.mxu1 }
 0x150   :  { %v1247_v16 = vpop.eup %1246  ;;  %v455_v17 = vadd.f32 %v1596_v25, %v454_v15  ;;  %v255_v18 = vpop.f32.mrf.mxu0 }
 0x151   :  { %v1249_v19 = vpop.eup %1248  ;;  %v256_v20 = vadd.f32 %v1494_v21, %v255_v18  ;;  %1121 = vmatmul.msk.f32.gmra.mxu2 %vm313_vm1, %v1247_v16 }
 0x152   :  { %1250 = vtanh.f32 %v455_v17  ;;  %1106 = vmatmul.msk.f32.gmra.mxu1 %vm313_vm1, %v1249_v19 }
 0x153   :  { %1252 = vtanh.f32 %v256_v20 }
 0x157   :  { %v457_v22 = vpop.f32.mrf.mxu1 }
 0x158   :  { %v1251_v23 = vpop.eup %1250  ;;  %v458_v24 = vadd.f32 %v1596_v25, %v457_v22  ;;  %v258_v26 = vpop.f32.mrf.mxu0 }
 0x159   :  { %v1253_v27 = vpop.eup %1252  ;;  %v259_v28 = vadd.f32 %v1494_v21, %v258_v26  ;;  %1122 = vmatmul.msk.f32.gmra.mxu2 %vm313_vm1, %v1251_v23 }
 0x15a   :  { %1254 = vtanh.f32 %v458_v24  ;;  %1107 = vmatmul.msk.f32.gmra.mxu1 %vm313_vm1, %v1253_v27 }
 0x15b   :  { %1256 = vtanh.f32 %v259_v28 }
 0x15f   :  { %v460_v29 = vpop.f32.mrf.mxu1 }
 0x160   :  { %v1255_v30 = vpop.eup %1254  ;;  %v461_v31 = vadd.f32 %v1596_v25, %v460_v29  ;;  %v261_v32 = vpop.f32.mrf.mxu0 }
 0x161   :  { %v1257_v33 = vpop.eup %1256  ;;  %v262_v34 = vadd.f32 %v1494_v21, %v261_v32  ;;  %1123 = vmatmul.msk.f32.gmra.mxu2 %vm313_vm1, %v1255_v30 }
 0x162   :  { %1258 = vtanh.f32 %v461_v31  ;;  %1108 = vmatmul.msk.f32.gmra.mxu1 %vm313_vm1, %v1257_v33 }
 0x163   :  { %1260 = vtanh.f32 %v262_v34 }
 0x167   :  { %v463_v35 = vpop.f32.mrf.mxu1 }
 0x168   :  { %v1259_v36 = vpop.eup %1258  ;;  %v464_v37 = vadd.f32 %v1596_v25, %v463_v35  ;;  %v264_v38 = vpop.f32.mrf.mxu0 }
 0x169   :  { %v1261_v39 = vpop.eup %1260  ;;  %v265_v40 = vadd.f32 %v1494_v21, %v264_v38  ;;  %1124 = vmatmul.msk.f32.gmra.mxu2 %vm313_vm1, %v1259_v36 }
 0x16a   :  { %1262 = vtanh.f32 %v464_v37  ;;  %1109 = vmatmul.msk.f32.gmra.mxu1 %vm313_vm1, %v1261_v39 }
 0x16b   :  { %1264 = vtanh.f32 %v265_v40 }
 0x16f   :  { %v466_v41 = vpop.f32.mrf.mxu1 }
 0x170   :  { %v1263_v42 = vpop.eup %1262  ;;  %v467_v43 = vadd.f32 %v1596_v25, %v466_v41  ;;  %v267_v44 = vpop.f32.mrf.mxu0 }
 0x171   :  { %v1265_v45 = vpop.eup %1264  ;;  %v268_v46 = vadd.f32 %v1494_v21, %v267_v44  ;;  %1125 = vmatmul.msk.f32.gmra.mxu2 %vm313_vm1, %v1263_v42 }
 0x172   :  { %1266 = vtanh.f32 %v467_v43  ;;  %1110 = vmatmul.msk.f32.gmra.mxu1 %vm313_vm1, %v1265_v45 }
 0x173   :  { %1268 = vtanh.f32 %v268_v46 }
 0x177   :  { %v469_v48 = vpop.f32.mrf.mxu1 }
 0x178   :  { %v1267_v49 = vpop.eup %1266  ;;  %v470_v50 = vadd.f32 %v1596_v25, %v469_v48  ;;  %v270_v51 = vpop.f32.mrf.mxu0 }
 0x179   :  { %v1269_v53 = vpop.eup %1268  ;;  %v271_v54 = vadd.f32 %v1494_v21, %v270_v51  ;;  %1126 = vmatmul.msk.f32.gmra.mxu2 %vm313_vm1, %v1267_v49 }
 0x17a   :  { %1270 = vtanh.f32 %v470_v50  ;;  %1111 = vmatmul.msk.f32.gmra.mxu1 %vm313_vm1, %v1269_v53 }
 0x17b   :  { %1272 = vtanh.f32 %v271_v54 }
 0x17f   :  { %v472_v57 = vpop.f32.mrf.mxu1 }
 0x180   :  { %v1271_v58 = vpop.eup %1270  ;;  %v473_v21 = vadd.f32 %v1596_v25, %v472_v57 }
 0x181   :  { %v1273_v59 = vpop.eup %1272  ;;  %1127 = vmatmul.msk.f32.gmra.mxu2 %vm313_vm1, %v1271_v58 }
 0x182   :  { %1274 = vtanh.f32 %v473_v21  ;;  %1112 = vmatmul.msk.f32.gmra.mxu1 %vm313_vm1, %v1273_v59 }
 0x187   :  { %v475_v60 = vpop.f32.mrf.mxu1 }
 0x188   :  { %v1275_v61 = vpop.eup %1274  ;;  %v476_v62 = vadd.f32 %v1596_v25, %v475_v60 }
 0x189   :  { %1128 = vmatmul.msk.f32.gmra.mxu2 %vm313_vm1, %v1275_v61 }
 0x18a   :  { %1276 = vtanh.f32 %v476_v62 }
 0x18f   :  { %v478_v63 = vpop.f32.mrf.mxu1 }
 0x190   :  { %v1277_v0 = vpop.eup %1276  ;;  %v479_v1 = vadd.f32 %v1596_v25, %v478_v63 }
 0x191   :  { %1129 = vmatmul.msk.f32.gmra.mxu2 %vm313_vm1, %v1277_v0 }
 0x192   :  { %1278 = vtanh.f32 %v479_v1 }
 0x194   :  { %v668_v2 = vpop.f32.mrf.mxu2 }
 0x195   :  { %v669_v3 = vadd.f32 %v1596_v25, %v668_v2 }
 0x197   :  { %1280 = vtanh.f32 %v669_v3  ;;  %v481_v4 = vpop.f32.mrf.mxu1 }
 0x198   :  { %v1279_v5 = vpop.eup %1278  ;;  %v482_v6 = vadd.f32 %v1596_v25, %v481_v4 }
 0x199   :  { %1130 = vmatmul.msk.f32.gmra.mxu2 %vm313_vm1, %v1279_v5 }
 0x19a   :  { %1282 = vtanh.f32 %v482_v6 }
 0x19c   :  { %v671_v7 = vpop.f32.mrf.mxu2 }
 0x19d   :  { %v1281_v8 = vpop.eup %1280  ;;  %v672_v9 = vadd.f32 %v1596_v25, %v671_v7 }
 0x19e   :  { %1145 = vmatmul.msk.f32.vlgmr.msra.gmra.mxu3 %vm313_vm1, %v1281_v8 }
 0x19f   :  { %1284 = vtanh.f32 %v672_v9  ;;  %v484_v10 = vpop.f32.mrf.mxu1 }
 0x1a0   :  { %v1283_v11 = vpop.eup %1282  ;;  %v485_v12 = vadd.f32 %v1596_v25, %v484_v10 }
 0x1a1   :  { %1131 = vmatmul.msk.f32.gmra.mxu2 %vm313_vm1, %v1283_v11 }
 0x1a2   :  { %1286 = vtanh.f32 %v485_v12 }
 0x1a4   :  { %v674_v13 = vpop.f32.mrf.mxu2 }
 0x1a5   :  { %v1285_v14 = vpop.eup %1284  ;;  %v675_v15 = vadd.f32 %v1596_v25, %v674_v13 }
 0x1a6   :  { %1146 = vmatmul.msk.f32.gmra.mxu3 %vm313_vm1, %v1285_v14 }
 0x1a7   :  { %1288 = vtanh.f32 %v675_v15  ;;  %v487_v16 = vpop.f32.mrf.mxu1 }
 0x1a8   :  { %v1287_v17 = vpop.eup %1286  ;;  %v488_v18 = vadd.f32 %v1596_v25, %v487_v16 }
 0x1a9   :  { %1132 = vmatmul.msk.f32.gmra.mxu2 %vm313_vm1, %v1287_v17 }
 0x1aa   :  { %1290 = vtanh.f32 %v488_v18 }
 0x1ac   :  { %v677_v19 = vpop.f32.mrf.mxu2 }
 0x1ad   :  { %v1289_v20 = vpop.eup %1288  ;;  %v678_v22 = vadd.f32 %v1596_v25, %v677_v19 }
 0x1ae   :  { %1147 = vmatmul.msk.f32.gmra.mxu3 %vm313_vm1, %v1289_v20 }
 0x1af   :  { %1292 = vtanh.f32 %v678_v22  ;;  %v490_v23 = vpop.f32.mrf.mxu1 }
 0x1b0   :  { %v1291_v24 = vpop.eup %1290  ;;  %v491_v26 = vadd.f32 %v1596_v25, %v490_v23 }
 0x1b1   :  { %1133 = vmatmul.msk.f32.gmra.mxu2 %vm313_vm1, %v1291_v24 }
 0x1b2   :  { %1294 = vtanh.f32 %v491_v26 }
 0x1b4   :  { %v680_v27 = vpop.f32.mrf.mxu2 }
 0x1b5   :  { %v1293_v28 = vpop.eup %1292  ;;  %v681_v29 = vadd.f32 %v1596_v25, %v680_v27 }
 0x1b6   :  { %1148 = vmatmul.msk.f32.gmra.mxu3 %vm313_vm1, %v1293_v28 }
 0x1b7   :  { %1296 = vtanh.f32 %v681_v29  ;;  %v493_v30 = vpop.f32.mrf.mxu1 }
 0x1b8   :  { %v1295_v31 = vpop.eup %1294  ;;  %v494_v32 = vadd.f32 %v1596_v25, %v493_v30 }
 0x1b9   :  { %1134 = vmatmul.msk.f32.gmra.mxu2 %vm313_vm1, %v1295_v31 }
 0x1ba   :  { %1298 = vtanh.f32 %v494_v32 }
 0x1bc   :  { %v683_v33 = vpop.f32.mrf.mxu2 }
 0x1bd   :  { %v1297_v34 = vpop.eup %1296  ;;  %v684_v35 = vadd.f32 %v1596_v25, %v683_v33 }
 0x1be   :  { %1149 = vmatmul.msk.f32.gmra.mxu3 %vm313_vm1, %v1297_v34 }
 0x1bf   :  { %1300 = vtanh.f32 %v684_v35  ;;  %v496_v36 = vpop.f32.mrf.mxu1 }
 0x1c0   :  { %v1299_v37 = vpop.eup %1298  ;;  %v497_v38 = vadd.f32 %v1596_v25, %v496_v36 }
 0x1c1   :  { %1135 = vmatmul.msk.f32.gmra.mxu2 %vm313_vm1, %v1299_v37  ;;  %v1743_v37 = vld [vmem:[%s1908_s6] ss:$0 sm:$0xff] }
 0x1c2   :  { %1302 = vtanh.f32 %v497_v38 }
 0x1c4   :  { %v686_v39 = vpop.f32.mrf.mxu2 }
 0x1c5   :  { %v1301_v40 = vpop.eup %1300  ;;  %v687_v41 = vadd.f32 %v1596_v25, %v686_v39 }
 0x1c6   :  { %1150 = vmatmul.msk.f32.gmra.mxu3 %vm313_vm1, %v1301_v40 }
 0x1c7   :  { %1304 = vtanh.f32 %v687_v41  ;;  %v499_v42 = vpop.f32.mrf.mxu1 }
 0x1c8   :  { %v1303_v43 = vpop.eup %1302  ;;  %v500_v44 = vadd.f32 %v1596_v25, %v499_v42 }
 0x1c9   :  { %1136 = vmatmul.msk.f32.gmra.mxu2 %vm313_vm1, %v1303_v43 }
 0x1ca   :  { %1306 = vtanh.f32 %v500_v44 }
 0x1cc   :  { %v689_v45 = vpop.f32.mrf.mxu2 }
 0x1cd   :  { %v1305_v46 = vpop.eup %1304  ;;  %v690_v47 = vadd.f32 %v1596_v25, %v689_v45 }
 0x1ce   :  { %1151 = vmatmul.msk.f32.gmra.mxu3 %vm313_vm1, %v1305_v46 }
 0x1cf   :  { %1308 = vtanh.f32 %v690_v47  ;;  %v502_v48 = vpop.f32.mrf.mxu1 }
 0x1d0   :  { %v1307_v49 = vpop.eup %1306  ;;  %v503_v50 = vadd.f32 %v1596_v25, %v502_v48 }
 0x1d1   :  { %1137 = vmatmul.msk.f32.gmra.mxu2 %vm313_vm1, %v1307_v49 }
 0x1d2   :  { %1310 = vtanh.f32 %v503_v50 }
 0x1d4   :  { %v692_v51 = vpop.f32.mrf.mxu2 }
 0x1d5   :  { %v1309_v52 = vpop.eup %1308  ;;  %v693_v53 = vadd.f32 %v1596_v25, %v692_v51 }
 0x1d6   :  { %1152 = vmatmul.msk.f32.gmra.mxu3 %vm313_vm1, %v1309_v52 }
 0x1d7   :  { %1312 = vtanh.f32 %v693_v53  ;;  %v505_v54 = vpop.f32.mrf.mxu1 }
 0x1d8   :  { %v1311_v55 = vpop.eup %1310  ;;  %v506_v56 = vadd.f32 %v1596_v25, %v505_v54 }
 0x1d9   :  { %1138 = vmatmul.msk.f32.gmra.mxu2 %vm313_vm1, %v1311_v55 }
 0x1da   :  { %1314 = vtanh.f32 %v506_v56 }
 0x1dc   :  { %v695_v57 = vpop.f32.mrf.mxu2 }
 0x1dd   :  { %v1313_v58 = vpop.eup %1312  ;;  %v696_v21 = vadd.f32 %v1596_v25, %v695_v57 }
 0x1de   :  { %1153 = vmatmul.msk.f32.gmra.mxu3 %vm313_vm1, %v1313_v58 }
 0x1df   :  { %1316 = vtanh.f32 %v696_v21  ;;  %v508_v59 = vpop.f32.mrf.mxu1 }
 0x1e0   :  { %v1315_v60 = vpop.eup %1314  ;;  %v509_v61 = vadd.f32 %v1596_v25, %v508_v59 }
 0x1e1   :  { %1139 = vmatmul.msk.f32.gmra.mxu2 %vm313_vm1, %v1315_v60 }
 0x1e2   :  { %1318 = vtanh.f32 %v509_v61 }
 0x1e4   :  { %v698_v62 = vpop.f32.mrf.mxu2 }
 0x1e5   :  { %v1317_v63 = vpop.eup %1316  ;;  %v699_v0 = vadd.f32 %v1596_v25, %v698_v62 }
 0x1e6   :  { %1154 = vmatmul.msk.f32.gmra.mxu3 %vm313_vm1, %v1317_v63 }
 0x1e7   :  { %1320 = vtanh.f32 %v699_v0  ;;  %v511_v1 = vpop.f32.mrf.mxu1 }
 0x1e8   :  { %v1319_v2 = vpop.eup %1318  ;;  %v512_v3 = vadd.f32 %v1596_v25, %v511_v1 }
 0x1e9   :  { %1140 = vmatmul.msk.f32.gmra.mxu2 %vm313_vm1, %v1319_v2 }
 0x1ea   :  { %1322 = vtanh.f32 %v512_v3 }
 0x1ec   :  { %v701_v4 = vpop.f32.mrf.mxu2 }
 0x1ed   :  { %v1321_v5 = vpop.eup %1320  ;;  %v702_v6 = vadd.f32 %v1596_v25, %v701_v4 }
 0x1ee   :  { %1155 = vmatmul.msk.f32.gmra.mxu3 %vm313_vm1, %v1321_v5 }
 0x1ef   :  { %1324 = vtanh.f32 %v702_v6  ;;  %v514_v7 = vpop.f32.mrf.mxu1 }
 0x1f0   :  { %v1323_v8 = vpop.eup %1322  ;;  %v515_v9 = vadd.f32 %v1596_v25, %v514_v7 }
 0x1f1   :  { %1141 = vmatmul.msk.f32.gmra.mxu2 %vm313_vm1, %v1323_v8 }
 0x1f2   :  { %1326 = vtanh.f32 %v515_v9 }
 0x1f4   :  { %v704_v10 = vpop.f32.mrf.mxu2 }
 0x1f5   :  { %v1325_v11 = vpop.eup %1324  ;;  %v705_v12 = vadd.f32 %v1596_v25, %v704_v10 }
 0x1f6   :  { %1156 = vmatmul.msk.f32.gmra.mxu3 %vm313_vm1, %v1325_v11 }
 0x1f7   :  { %1328 = vtanh.f32 %v705_v12  ;;  %v517_v13 = vpop.f32.mrf.mxu1 }
 0x1f8   :  { %v1327_v14 = vpop.eup %1326  ;;  %v518_v15 = vadd.f32 %v1596_v25, %v517_v13 }
 0x1f9   :  { %1142 = vmatmul.msk.f32.gmra.mxu2 %vm313_vm1, %v1327_v14 }
 0x1fa   :  { %1330 = vtanh.f32 %v518_v15 }
 0x1fc   :  { %v707_v16 = vpop.f32.mrf.mxu2 }
 0x1fd   :  { %v1329_v17 = vpop.eup %1328  ;;  %v708_v18 = vadd.f32 %v1596_v25, %v707_v16 }
 0x1fe   :  { %1157 = vmatmul.msk.f32.gmra.mxu3 %vm313_vm1, %v1329_v17 }
 0x1ff   :  { %1332 = vtanh.f32 %v708_v18  ;;  %v520_v19 = vpop.f32.mrf.mxu1 }
 0x200   :  { %v1331_v20 = vpop.eup %1330  ;;  %v521_v22 = vadd.f32 %v1596_v25, %v520_v19 }
 0x201   :  { %1143 = vmatmul.msk.f32.gmra.mxu2 %vm313_vm1, %v1331_v20 }
 0x202   :  { %1334 = vtanh.f32 %v521_v22 }
 0x204   :  { %v710_v23 = vpop.f32.mrf.mxu2 }
 0x205   :  { %v1333_v24 = vpop.eup %1332  ;;  %v711_v26 = vadd.f32 %v1596_v25, %v710_v23 }
 0x206   :  { %1158 = vmatmul.msk.f32.gmra.mxu3 %vm313_vm1, %v1333_v24 }
 0x207   :  { %1336 = vtanh.f32 %v711_v26 }
 0x208   :  { %v1335_v27 = vpop.eup %1334 }
 0x209   :  { %1144 = vmatmul.msk.f32.gmra.mxu2 %vm313_vm1, %v1335_v27 }
 0x20c   :  { %v713_v28 = vpop.f32.mrf.mxu2 }
 0x20d   :  { %v1337_v29 = vpop.eup %1336  ;;  %v714_v30 = vadd.f32 %v1596_v25, %v713_v28 }
 0x20e   :  { %1159 = vmatmul.msk.f32.gmra.mxu3 %vm313_vm1, %v1337_v29 }
 0x20f   :  { %1338 = vtanh.f32 %v714_v30 }
 0x214   :  { %v716_v31 = vpop.f32.mrf.mxu2 }
 0x215   :  { %v1339_v32 = vpop.eup %1338  ;;  %v717_v33 = vadd.f32 %v1596_v25, %v716_v31 }
 0x216   :  { %1160 = vmatmul.msk.f32.gmra.mxu3 %vm313_vm1, %v1339_v32 }
 0x217   :  { %1340 = vtanh.f32 %v717_v33 }
 0x21c   :  { %v719_v34 = vpop.f32.mrf.mxu2 }
 0x21d   :  { %v1341_v35 = vpop.eup %1340  ;;  %v720_v36 = vadd.f32 %v1596_v25, %v719_v34 }
 0x21e   :  { %1161 = vmatmul.msk.f32.gmra.mxu3 %vm313_vm1, %v1341_v35 }
 0x21f   :  { %1342 = vtanh.f32 %v720_v36 }
 0x221   :  { %v917_v38 = vpop.f32.mrf.mxu3 }
 0x222   :  { %v918_v39 = vadd.f32 %v1743_v37, %v917_v38 }
 0x224   :  { %1013 = vst [vmem:[%s1909_s7] sm:$0xff] %v918_v39  ;;  %v722_v40 = vpop.f32.mrf.mxu2 }
 0x225   :  { %v1343_v41 = vpop.eup %1342  ;;  %v723_v42 = vadd.f32 %v1596_v25, %v722_v40 }
 0x226   :  { %1162 = vmatmul.msk.f32.gmra.mxu3 %vm313_vm1, %v1343_v41 }
 0x227   :  { %1344 = vtanh.f32 %v723_v42 }
 0x229   :  { %v920_v43 = vpop.f32.mrf.mxu3 }
 0x22a   :  { %v921_v44 = vadd.f32 %v1743_v37, %v920_v43 }
 0x22c   :  { %1014 = vst [vmem:[%s1909_s7 + $0x8] sm:$0xff] %v921_v44  ;;  %v725_v45 = vpop.f32.mrf.mxu2 }
 0x22d   :  { %v1345_v46 = vpop.eup %1344  ;;  %v726_v47 = vadd.f32 %v1596_v25, %v725_v45 }
 0x22e   :  { %1163 = vmatmul.msk.f32.gmra.mxu3 %vm313_vm1, %v1345_v46 }
 0x22f   :  { %1346 = vtanh.f32 %v726_v47 }
 0x231   :  { %v923_v48 = vpop.f32.mrf.mxu3 }
 0x232   :  { %v924_v49 = vadd.f32 %v1743_v37, %v923_v48 }
 0x234   :  { %1015 = vst [vmem:[%s1909_s7 + $0x10] sm:$0xff] %v924_v49  ;;  %v728_v50 = vpop.f32.mrf.mxu2 }
 0x235   :  { %v1347_v51 = vpop.eup %1346  ;;  %v729_v52 = vadd.f32 %v1596_v25, %v728_v50 }
 0x236   :  { %1164 = vmatmul.msk.f32.gmra.mxu3 %vm313_vm1, %v1347_v51 }
 0x237   :  { %1348 = vtanh.f32 %v729_v52 }
 0x239   :  { %v926_v53 = vpop.f32.mrf.mxu3 }
 0x23a   :  { %v927_v54 = vadd.f32 %v1743_v37, %v926_v53 }
 0x23c   :  { %1016 = vst [vmem:[%s1909_s7 + $0x18] sm:$0xff] %v927_v54  ;;  %v731_v55 = vpop.f32.mrf.mxu2 }
 0x23d   :  { %v1349_v56 = vpop.eup %1348  ;;  %v732_v57 = vadd.f32 %v1596_v25, %v731_v55 }
 0x23e   :  { %1165 = vmatmul.msk.f32.gmra.mxu3 %vm313_vm1, %v1349_v56 }
 0x23f   :  { %1350 = vtanh.f32 %v732_v57 }
 0x241   :  { %v929_v58 = vpop.f32.mrf.mxu3 }
 0x242   :  { %v930_v21 = vadd.f32 %v1743_v37, %v929_v58 }
 0x244   :  { %1017 = vst [vmem:[%s1909_s7 + $0x20] sm:$0xff] %v930_v21  ;;  %v734_v59 = vpop.f32.mrf.mxu2 }
 0x245   :  { %v1351_v60 = vpop.eup %1350  ;;  %v735_v61 = vadd.f32 %v1596_v25, %v734_v59 }
 0x246   :  { %1166 = vmatmul.msk.f32.gmra.mxu3 %vm313_vm1, %v1351_v60 }
 0x247   :  { %1352 = vtanh.f32 %v735_v61 }
 0x249   :  { %v932_v62 = vpop.f32.mrf.mxu3 }
 0x24a   :  { %v933_v63 = vadd.f32 %v1743_v37, %v932_v62 }
 0x24c   :  { %1018 = vst [vmem:[%s1909_s7 + $0x28] sm:$0xff] %v933_v63  ;;  %v737_v0 = vpop.f32.mrf.mxu2 }
 0x24d   :  { %v1353_v1 = vpop.eup %1352  ;;  %v738_v2 = vadd.f32 %v1596_v25, %v737_v0 }
 0x24e   :  { %1167 = vmatmul.msk.f32.gmra.mxu3 %vm313_vm1, %v1353_v1 }
 0x24f   :  { %1354 = vtanh.f32 %v738_v2 }
 0x251   :  { %v935_v3 = vpop.f32.mrf.mxu3 }
 0x252   :  { %v936_v4 = vadd.f32 %v1743_v37, %v935_v3 }
 0x254   :  { %1019 = vst [vmem:[%s1909_s7 + $0x30] sm:$0xff] %v936_v4  ;;  %v740_v5 = vpop.f32.mrf.mxu2 }
 0x255   :  { %v1355_v6 = vpop.eup %1354  ;;  %v741_v7 = vadd.f32 %v1596_v25, %v740_v5 }
 0x256   :  { %1168 = vmatmul.msk.f32.gmra.mxu3 %vm313_vm1, %v1355_v6 }
 0x257   :  { %1356 = vtanh.f32 %v741_v7 }
 0x259   :  { %v938_v8 = vpop.f32.mrf.mxu3 }
 0x25a   :  { %v939_v9 = vadd.f32 %v1743_v37, %v938_v8 }
 0x25c   :  { %1020 = vst [vmem:[%s1909_s7 + $0x38] sm:$0xff] %v939_v9  ;;  %v743_v10 = vpop.f32.mrf.mxu2 }
 0x25d   :  { %v1357_v11 = vpop.eup %1356  ;;  %v744_v12 = vadd.f32 %v1596_v25, %v743_v10 }
 0x25e   :  { %1169 = vmatmul.msk.f32.gmra.mxu3 %vm313_vm1, %v1357_v11 }
 0x25f   :  { %1358 = vtanh.f32 %v744_v12 }
 0x261   :  { %v941_v13 = vpop.f32.mrf.mxu3 }
 0x262   :  { %v942_v14 = vadd.f32 %v1743_v37, %v941_v13 }
 0x264   :  { %1021 = vst [vmem:[%s1909_s7 + $0x40] sm:$0xff] %v942_v14  ;;  %v746_v15 = vpop.f32.mrf.mxu2 }
 0x265   :  { %v1359_v16 = vpop.eup %1358  ;;  %v747_v17 = vadd.f32 %v1596_v25, %v746_v15 }
 0x266   :  { %1170 = vmatmul.msk.f32.gmra.mxu3 %vm313_vm1, %v1359_v16 }
 0x267   :  { %1360 = vtanh.f32 %v747_v17 }
 0x269   :  { %v944_v18 = vpop.f32.mrf.mxu3 }
 0x26a   :  { %v945_v19 = vadd.f32 %v1743_v37, %v944_v18 }
 0x26c   :  { %1022 = vst [vmem:[%s1909_s7 + $0x48] sm:$0xff] %v945_v19  ;;  %v749_v20 = vpop.f32.mrf.mxu2 }
 0x26d   :  { %v1361_v22 = vpop.eup %1360  ;;  %v750_v23 = vadd.f32 %v1596_v25, %v749_v20 }
 0x26e   :  { %1171 = vmatmul.msk.f32.gmra.mxu3 %vm313_vm1, %v1361_v22 }
 0x26f   :  { %1362 = vtanh.f32 %v750_v23 }
 0x271   :  { %v947_v24 = vpop.f32.mrf.mxu3 }
 0x272   :  { %v948_v26 = vadd.f32 %v1743_v37, %v947_v24 }
 0x274   :  { %1023 = vst [vmem:[%s1909_s7 + $0x50] sm:$0xff] %v948_v26  ;;  %v752_v27 = vpop.f32.mrf.mxu2 }
 0x275   :  { %v1363_v28 = vpop.eup %1362  ;;  %v753_v29 = vadd.f32 %v1596_v25, %v752_v27 }
 0x276   :  { %1172 = vmatmul.msk.f32.gmra.mxu3 %vm313_vm1, %v1363_v28 }
 0x277   :  { %1364 = vtanh.f32 %v753_v29 }
 0x279   :  { %v950_v30 = vpop.f32.mrf.mxu3 }
 0x27a   :  { %v951_v31 = vadd.f32 %v1743_v37, %v950_v30 }
 0x27c   :  { %1024 = vst [vmem:[%s1909_s7 + $0x58] sm:$0xff] %v951_v31  ;;  %v755_v32 = vpop.f32.mrf.mxu2 }
 0x27d   :  { %v1365_v33 = vpop.eup %1364  ;;  %v756_v34 = vadd.f32 %v1596_v25, %v755_v32 }
 0x27e   :  { %1173 = vmatmul.msk.f32.gmra.mxu3 %vm313_vm1, %v1365_v33 }
 0x27f   :  { %1366 = vtanh.f32 %v756_v34 }
 0x281   :  { %v953_v35 = vpop.f32.mrf.mxu3 }
 0x282   :  { %v954_v36 = vadd.f32 %v1743_v37, %v953_v35 }
 0x284   :  { %1025 = vst [vmem:[%s1909_s7 + $0x60] sm:$0xff] %v954_v36  ;;  %v758_v38 = vpop.f32.mrf.mxu2 }
 0x285   :  { %v1367_v39 = vpop.eup %1366  ;;  %v759_v40 = vadd.f32 %v1596_v25, %v758_v38 }
 0x286   :  { %1174 = vmatmul.msk.f32.gmra.mxu3 %vm313_vm1, %v1367_v39 }
 0x287   :  { %1368 = vtanh.f32 %v759_v40 }
 0x289   :  { %v956_v41 = vpop.f32.mrf.mxu3 }
 0x28a   :  { %v957_v42 = vadd.f32 %v1743_v37, %v956_v41 }
 0x28c   :  { %1026 = vst [vmem:[%s1909_s7 + $0x68] sm:$0xff] %v957_v42  ;;  %v761_v43 = vpop.f32.mrf.mxu2 }
 0x28d   :  { %v1369_v44 = vpop.eup %1368  ;;  %v762_v45 = vadd.f32 %v1596_v25, %v761_v43 }
 0x28e   :  { %1175 = vmatmul.msk.f32.gmra.mxu3 %vm313_vm1, %v1369_v44 }
 0x28f   :  { %1370 = vtanh.f32 %v762_v45 }
 0x291   :  { %v959_v46 = vpop.f32.mrf.mxu3 }
 0x292   :  { %v960_v47 = vadd.f32 %v1743_v37, %v959_v46 }
 0x294   :  { %1027 = vst [vmem:[%s1909_s7 + $0x70] sm:$0xff] %v960_v47 }
 0x295   :  { %v1371_v48 = vpop.eup %1370 }
 0x296   :  { %1176 = vmatmul.msk.f32.gmra.mxu3 %vm313_vm1, %v1371_v48 }
 0x299   :  { %v962_v49 = vpop.f32.mrf.mxu3 }
 0x29a   :  { %v963_v50 = vadd.f32 %v1743_v37, %v962_v49 }
 0x29c   :  { %1028 = vst [vmem:[%s1909_s7 + $0x78] sm:$0xff] %v963_v50 }
 0x2a1   :  { %v965_v25 = vpop.f32.mrf.mxu3 }
 0x2a2   :  { %v966_v51 = vadd.f32 %v1743_v37, %v965_v25 }
 0x2a4   :  { %1029 = vst [vmem:[%s1909_s7 + $0x80] sm:$0xff] %v966_v51 }
 0x2a9   :  { %v968_v52 = vpop.f32.mrf.mxu3 }
 0x2aa   :  { %v969_v53 = vadd.f32 %v1743_v37, %v968_v52 }
 0x2ac   :  { %1030 = vst [vmem:[%s1909_s7 + $0x88] sm:$0xff] %v969_v53 }
 0x2b1   :  { %v971_v54 = vpop.f32.mrf.mxu3 }
 0x2b2   :  { %v972_v55 = vadd.f32 %v1743_v37, %v971_v54 }
 0x2b4   :  { %1031 = vst [vmem:[%s1909_s7 + $0x90] sm:$0xff] %v972_v55 }
 0x2b9   :  { %v974_v56 = vpop.f32.mrf.mxu3 }
 0x2ba   :  { %v975_v57 = vadd.f32 %v1743_v37, %v974_v56 }
 0x2bc   :  { %1032 = vst [vmem:[%s1909_s7 + $0x98] sm:$0xff] %v975_v57 }
 0x2c1   :  { %v977_v58 = vpop.f32.mrf.mxu3 }
 0x2c2   :  { %v978_v21 = vadd.f32 %v1743_v37, %v977_v58 }
 0x2c4   :  { %1033 = vst [vmem:[%s1909_s7 + $0xa0] sm:$0xff] %v978_v21 }
 0x2c9   :  { %v980_v59 = vpop.f32.mrf.mxu3 }
 0x2ca   :  { %v981_v60 = vadd.f32 %v1743_v37, %v980_v59 }
 0x2cc   :  { %1034 = vst [vmem:[%s1909_s7 + $0xa8] sm:$0xff] %v981_v60 }
 0x2d1   :  { %v983_v61 = vpop.f32.mrf.mxu3 }
 0x2d2   :  { %v984_v62 = vadd.f32 %v1743_v37, %v983_v61 }
 0x2d4   :  { %1035 = vst [vmem:[%s1909_s7 + $0xb0] sm:$0xff] %v984_v62 }
 0x2d9   :  { %v986_v63 = vpop.f32.mrf.mxu3 }
 0x2da   :  { %v987_v0 = vadd.f32 %v1743_v37, %v986_v63 }
 0x2dc   :  { %1036 = vst [vmem:[%s1909_s7 + $0xb8] sm:$0xff] %v987_v0 }
 0x2e1   :  { %v989_v1 = vpop.f32.mrf.mxu3 }
 0x2e2   :  { %v990_v2 = vadd.f32 %v1743_v37, %v989_v1 }
 0x2e4   :  { %1037 = vst [vmem:[%s1909_s7 + $0xc0] sm:$0xff] %v990_v2 }
 0x2e9   :  { %v992_v3 = vpop.f32.mrf.mxu3 }
 0x2ea   :  { %v993_v4 = vadd.f32 %v1743_v37, %v992_v3 }
 0x2ec   :  { %1038 = vst [vmem:[%s1909_s7 + $0xc8] sm:$0xff] %v993_v4 }
 0x2f1   :  { %v995_v5 = vpop.f32.mrf.mxu3 }
 0x2f2   :  { %v996_v6 = vadd.f32 %v1743_v37, %v995_v5 }
 0x2f4   :  { %1039 = vst [vmem:[%s1909_s7 + $0xd0] sm:$0xff] %v996_v6 }
 0x2f9   :  { %v998_v7 = vpop.f32.mrf.mxu3 }
 0x2fa   :  { %v999_v8 = vadd.f32 %v1743_v37, %v998_v7 }
 0x2fc   :  { %1040 = vst [vmem:[%s1909_s7 + $0xd8] sm:$0xff] %v999_v8 }
 0x301   :  { %v1001_v9 = vpop.f32.mrf.mxu3 }
 0x302   :  { %v1002_v10 = vadd.f32 %v1743_v37, %v1001_v9 }
 0x304   :  { %1041 = vst [vmem:[%s1909_s7 + $0xe0] sm:$0xff] %v1002_v10 }
 0x309   :  { %v1004_v11 = vpop.f32.mrf.mxu3 }
 0x30a   :  { %v1005_v12 = vadd.f32 %v1743_v37, %v1004_v11 }
 0x30c   :  { %1042 = vst [vmem:[%s1909_s7 + $0xe8] sm:$0xff] %v1005_v12 }
 0x311   :  { %v1007_v13 = vpop.f32.mrf.mxu3 }
 0x312   :  { %v1008_v14 = vadd.f32 %v1743_v37, %v1007_v13 }
 0x314   :  { %1043 = vst [vmem:[%s1909_s7 + $0xf0] sm:$0xff] %v1008_v14 }
 0x319   :  { %v1010_v15 = vpop.f32.mrf.mxu3 }
 0x31a   :  { %v1011_v16 = vadd.f32 %v1743_v37, %v1010_v15 }
 0x31c   :  { %1044 = vst [vmem:[%s1909_s7 + $0xf8] sm:$0xff] %v1011_v16 }

</bundles_post_ra>
